<compile_context>
chip_gen: v7x
topology: tpu7x:2x2x1
jax: 0.10.0
libtpu: 0.0.40
codegen_flags: <defaults>
</compile_context>

<pallas_src>
import functools

import numpy as np

import jax
import jax.numpy as jnp
from jax import lax
from jax.experimental import pallas as pl
from jax.experimental.pallas import tpu as pltpu

_LANE = 128
_SUBLANE = 8
_VMEM_LIMIT_BYTES = 32 * 1024 * 1024       # request 32 MiB scoped VMEM everywhere
_VMEM_TILE_BUDGET = 20 * 1024 * 1024       # budget for resident tiles (headroom kept)


def _round_up(x, m):
    return ((x + m - 1) // m) * m


def _is_identity_index(idx, nnodes):
    """True iff idx is a *concrete* array equal to arange(nnodes)."""
    try:
        idx_host = np.asarray(idx)
    except Exception:          # traced value (under jit) -> use the gather path
        return False
    return idx_host.shape == (nnodes,) and np.array_equal(
        idx_host.astype(np.int64), np.arange(nnodes, dtype=np.int64))


def _num_tensorcores():
    """2 for chips with 2 TensorCores (v7x, megacore v4/v5p), else 1."""
    try:
        kind = jax.devices()[0].device_kind.lower()
    except Exception:
        return 1
    return 2 if any(tag in kind for tag in ("v7", "v4", "v5p")) else 1


def _pick_row_blocks(ni_pad, dim_pad, nv_itemsize):
    """Row-block count for the adjacency grid: >=2 only for 2-TC chips, then
    split further only if the double-buffered output tile busts the budget."""
    min_blocks = 2 if (_num_tensorcores() > 1 and ni_pad >= 2 * _LANE) else 1

    def fits(nb):
        tile_rows = ni_pad // nb
        nv_bytes = 2 * ni_pad * dim_pad * nv_itemsize * 2    # nv1+nv2 (double-buffered)
        out_bytes = tile_rows * ni_pad * 4 * 2               # f32 out tile (double-buffered)
        return nv_bytes + out_bytes <= _VMEM_TILE_BUDGET

    n_blocks = min_blocks
    while (not fits(n_blocks)) and n_blocks < 16 and (ni_pad // (n_blocks * 2)) >= _SUBLANE:
        n_blocks *= 2
    # TODO(synk): for extremely large ni (ni_pad >~ 16k) add a second (column)
    # grid axis instead of relying on row splits alone.
    return n_blocks


# --------------------------------------------------------------------------
# Projection kernels: nv_k = tanh(alpha * (emb_k[idx] @ W_k^T + b_k)), k=1,2
# --------------------------------------------------------------------------

def _project_identity_kernel(emb1_ref, emb2_ref, w1t_ref, b1_ref, w2t_ref, b2_ref,
                             nv1_ref, nv2_ref, *, alpha):
    """idx == arange(nnodes): no gather, the (padded) tables ARE the rows."""
    nv1_ref[...] = jnp.tanh(alpha * (
        jnp.dot(emb1_ref[...], w1t_ref[...], preferred_element_type=jnp.float32)
        + b1_ref[...]))
    nv2_ref[...] = jnp.tanh(alpha * (
        jnp.dot(emb2_ref[...], w2t_ref[...], preferred_element_type=jnp.float32)
        + b2_ref[...]))


def _project_gather_kernel(idx_ref,                     # SMEM (ni_pad,) int32 (prefetch)
                           emb1_ref, emb2_ref,          # VMEM (nnodes_p, dim_pad)
                           w1t_ref, b1_ref, w2t_ref, b2_ref,
                           nv1_ref, nv2_ref,            # VMEM (ni_pad, dim_pad) outputs
                           *, alpha):
    """General idx: per-row dynamic-slice gather from SMEM indices (no one-hot)."""
    ni_pad = nv1_ref.shape[0]

    def gather_row(r, carry):
        row = idx_ref[r]
        nv1_ref[pl.ds(r, 1), :] = emb1_ref[pl.ds(row, 1), :]
        nv2_ref[pl.ds(r, 1), :] = emb2_ref[pl.ds(row, 1), :]
        return carry

    lax.fori_loop(0, ni_pad, gather_row, 0)

    nv1_ref[...] = jnp.tanh(alpha * (
        jnp.dot(nv1_ref[...], w1t_ref[...], preferred_element_type=jnp.float32)
        + b1_ref[...]))
    nv2_ref[...] = jnp.tanh(alpha * (
        jnp.dot(nv2_ref[...], w2t_ref[...], preferred_element_type=jnp.float32)
        + b2_ref[...]))


def _project(idx_pad, emb1_p, emb2_p, w1t_p, b1_p, w2t_p, b2_p, alpha,
             ni_pad, identity):
    dim_pad = emb1_p.shape[1]
    rows = emb1_p.shape[0]
    out_shape = (jax.ShapeDtypeStruct((ni_pad, dim_pad), jnp.float32),
                 jax.ShapeDtypeStruct((ni_pad, dim_pad), jnp.float32))
    cparams = pltpu.CompilerParams(dimension_semantics=("arbitrary",),
                                   vmem_limit_bytes=_VMEM_LIMIT_BYTES)

    if identity:
        kern = functools.partial(_project_identity_kernel, alpha=alpha)
        return pl.pallas_call(
            kern,
            out_shape=out_shape,
            grid=(1,),
            in_specs=[
                pl.BlockSpec((rows, dim_pad), lambda i: (0, 0)),     # emb1 (== rows)
                pl.BlockSpec((rows, dim_pad), lambda i: (0, 0)),     # emb2
                pl.BlockSpec((dim_pad, dim_pad), lambda i: (0, 0)),  # W1^T
                pl.BlockSpec((1, dim_pad), lambda i: (0, 0)),        # b1
                pl.BlockSpec((dim_pad, dim_pad), lambda i: (0, 0)),  # W2^T
                pl.BlockSpec((1, dim_pad), lambda i: (0, 0)),        # b2
            ],
            out_specs=[pl.BlockSpec((ni_pad, dim_pad), lambda i: (0, 0)),
                       pl.BlockSpec((ni_pad, dim_pad), lambda i: (0, 0))],
            compiler_params=cparams,
        )(emb1_p, emb2_p, w1t_p, b1_p, w2t_p, b2_p)

    kern = functools.partial(_project_gather_kernel, alpha=alpha)
    grid_spec = pltpu.PrefetchScalarGridSpec(
        num_scalar_prefetch=1,
        grid=(1,),
        in_specs=[
            pl.BlockSpec((rows, dim_pad), lambda i, idx: (0, 0)),     # emb1 table
            pl.BlockSpec((rows, dim_pad), lambda i, idx: (0, 0)),     # emb2 table
            pl.BlockSpec((dim_pad, dim_pad), lambda i, idx: (0, 0)),  # W1^T
            pl.BlockSpec((1, dim_pad), lambda i, idx: (0, 0)),        # b1
            pl.BlockSpec((dim_pad, dim_pad), lambda i, idx: (0, 0)),  # W2^T
            pl.BlockSpec((1, dim_pad), lambda i, idx: (0, 0)),        # b2
        ],
        out_specs=[pl.BlockSpec((ni_pad, dim_pad), lambda i, idx: (0, 0)),
                   pl.BlockSpec((ni_pad, dim_pad), lambda i, idx: (0, 0))],
    )
    return pl.pallas_call(
        kern, out_shape=out_shape, grid_spec=grid_spec, compiler_params=cparams,
    )(idx_pad, emb1_p, emb2_p, w1t_p, b1_p, w2t_p, b2_p)


# --------------------------------------------------------------------------
# Adjacency kernel: adj = nv1 @ nv2^T - nv2 @ nv1^T (row-blocked, lane-dense)
# --------------------------------------------------------------------------

def _adj_kernel(nv1_ref, nv2_ref, out_ref, *, tile_rows):
    r0 = pl.multiple_of(pl.program_id(0) * tile_rows, _SUBLANE)
    nv1_blk = nv1_ref[pl.ds(r0, tile_rows), :]
    nv2_blk = nv2_ref[pl.ds(r0, tile_rows), :]
    dn_t = (((1,), (1,)), ((), ()))   # contract last dims: x @ y^T
    s1 = lax.dot_general(nv1_blk, nv2_ref[...], dn_t,
                         preferred_element_type=jnp.float32)
    s2 = lax.dot_general(nv2_blk, nv1_ref[...], dn_t,
                         preferred_element_type=jnp.float32)
    out_ref[...] = s1 - s2


# --------------------------------------------------------------------------
# Wrapper
# --------------------------------------------------------------------------

def space_graph(idx, emb1, emb2, w1, b1, w2, b2, alpha, *, bf16_adjacency=False):
    ni = int(idx.shape[0])
    nnodes, dim = emb1.shape
    dim_pad = _round_up(dim, _LANE)
    ni_pad = _round_up(max(ni, _SUBLANE), _LANE)
    alpha = float(alpha)

    identity = _is_identity_index(idx, nnodes) and ni == nnodes

    # Host-side layout prep: pre-transposed, zero-padded weights / bias / tables.
    w1t_p = jnp.zeros((dim_pad, dim_pad), jnp.float32).at[:dim, :dim].set(
        jnp.asarray(w1, jnp.float32).T)
    w2t_p = jnp.zeros((dim_pad, dim_pad), jnp.float32).at[:dim, :dim].set(
        jnp.asarray(w2, jnp.float32).T)
    b1_p = jnp.zeros((1, dim_pad), jnp.float32).at[0, :dim].set(
        jnp.asarray(b1, jnp.float32))
    b2_p = jnp.zeros((1, dim_pad), jnp.float32).at[0, :dim].set(
        jnp.asarray(b2, jnp.float32))

    emb_rows = ni_pad if identity else _round_up(nnodes, _SUBLANE)
    emb1_p = jnp.zeros((emb_rows, dim_pad), jnp.float32).at[:nnodes, :dim].set(
        jnp.asarray(emb1, jnp.float32))
    emb2_p = jnp.zeros((emb_rows, dim_pad), jnp.float32).at[:nnodes, :dim].set(
        jnp.asarray(emb2, jnp.float32))

    if identity:
        idx_pad = None
    else:
        idx_safe = jnp.clip(jnp.asarray(idx, jnp.int32), 0, nnodes - 1)
        idx_pad = jnp.zeros((ni_pad,), jnp.int32).at[:ni].set(idx_safe)

    # Phase 1: projection (done exactly once).
    nv1, nv2 = _project(idx_pad, emb1_p, emb2_p, w1t_p, b1_p, w2t_p, b2_p,
                        alpha, ni_pad, identity)

    # Phase 2: adjacency matmuls, row-blocked over a "parallel" grid.
    if bf16_adjacency:
        nv1 = nv1.astype(jnp.bfloat16)
        nv2 = nv2.astype(jnp.bfloat16)

    n_blocks = _pick_row_blocks(ni_pad, dim_pad, jnp.dtype(nv1.dtype).itemsize)
    tile_rows = ni_pad // n_blocks

    adj_pad = pl.pallas_call(
        functools.partial(_adj_kernel, tile_rows=tile_rows),
        out_shape=jax.ShapeDtypeStruct((ni_pad, ni_pad), jnp.float32),
        grid=(n_blocks,),
        in_specs=[pl.BlockSpec((ni_pad, dim_pad), lambda i: (0, 0)),
                  pl.BlockSpec((ni_pad, dim_pad), lambda i: (0, 0))],
        out_specs=pl.BlockSpec((tile_rows, ni_pad), lambda i: (i, 0)),
        compiler_params=pltpu.CompilerParams(
            dimension_semantics=("parallel",),
            vmem_limit_bytes=_VMEM_LIMIT_BYTES),
    )(nv1, nv2)
    return adj_pad[:ni, :ni]


class SpaceGraphConstructorPallas:
    """JAX/Pallas port of spacegraph_constructor (static_feat=None branch)."""

    def __init__(self, nnodes, k, dim, alpha=1.0, *, key):
        self.nnodes = nnodes
        self.k = k
        self.dim = dim
        self.alpha = float(alpha)
        ks = jax.random.split(key, 6)
        bound = 1.0 / (dim ** 0.5)
        # nn.Embedding default init: N(0, 1); nn.Linear default: U(-1/sqrt(in), 1/sqrt(in)).
        self.emb1 = jax.random.normal(ks[0], (nnodes, dim), jnp.float32)
        self.emb2 = jax.random.normal(ks[1], (nnodes, dim), jnp.float32)
        self.w1 = jax.random.uniform(ks[2], (dim, dim), jnp.float32, -bound, bound)
        self.b1 = jax.random.uniform(ks[3], (dim,), jnp.float32, -bound, bound)
        self.w2 = jax.random.uniform(ks[4], (dim, dim), jnp.float32, -bound, bound)
        self.b2 = jax.random.uniform(ks[5], (dim,), jnp.float32, -bound, bound)
        # TODO(synk): static_feat-is-not-None branch not wired (same kernel math with
        # emb1 = emb2 = static_feat and (dim, xd) linear weights).

    def __call__(self, idx):
        return space_graph(idx, self.emb1, self.emb2,
                           self.w1, self.b1, self.w2, self.b2, self.alpha)


def _reference(idx, emb1, emb2, w1, b1, w2, b2, alpha):
    nv1 = jnp.tanh(alpha * (emb1[idx] @ w1.T + b1))
    nv2 = jnp.tanh(alpha * (emb2[idx] @ w2.T + b2))
    return nv1 @ nv2.T - nv2 @ nv1.T


if __name__ == "__main__":
    key = jax.random.PRNGKey(0)
    nnodes, node_hidden, top_k = 16, 32, 4

    module = SpaceGraphConstructorPallas(nnodes, top_k, node_hidden, alpha=1.0, key=key)

    # (1) Typical call in the parent module: sgc(arange(n_nodes)) -> gather-free path.
    idx = jnp.arange(nnodes, dtype=jnp.int32)
    adj = jax.block_until_ready(module(idx))
    assert adj.shape == (nnodes, nnodes)
    assert bool(jnp.all(jnp.isfinite(adj)))
    ref = _reference(idx, module.emb1, module.emb2, module.w1, module.b1,
                     module.w2, module.b2, module.alpha)
    assert bool(jnp.allclose(adj, ref, atol=1e-2, rtol=1e-2))

    # (2) Unordered subset (pattern sub-graph case) -> in-kernel SMEM gather path.
    idx2 = jnp.array([3, 7, 11, 2, 9, 0, 15, 8], dtype=jnp.int32)
    adj2 = jax.block_until_ready(module(idx2))
    ref2 = _reference(idx2, module.emb1, module.emb2, module.w1, module.b1,
                      module.w2, module.b2, module.alpha)
    assert adj2.shape == (8, 8)
    assert bool(jnp.allclose(adj2, ref2, atol=1e-2, rtol=1e-2))

    # (3) Same subset under jit (idx traced -> identity detection falls back to gather).
    adj3 = jax.block_until_ready(jax.jit(module.__call__)(idx2))
    assert bool(jnp.allclose(adj3, ref2, atol=1e-2, rtol=1e-2))

    # (4) Optional reduced-precision adjacency path (bf16 MXU inputs, f32 accumulate).
    adj4 = jax.block_until_ready(
        space_graph(idx, module.emb1, module.emb2, module.w1, module.b1,
                    module.w2, module.b2, module.alpha, bf16_adjacency=True))
    assert adj4.shape == (nnodes, nnodes)
    assert bool(jnp.allclose(adj4, ref, atol=1e-1, rtol=1e-1))

    print("KERNEL_OK")
</pallas_src>

<mosaic_0001>
module attributes {stable_mosaic.version = 11 : i64} {
  func.func @_project_identity_kernel(%arg0: i32, %arg1: memref<128x128xf32, #tpu.memory_space<vmem>>, %arg2: memref<128x128xf32, #tpu.memory_space<vmem>>, %arg3: memref<128x128xf32, #tpu.memory_space<vmem>>, %arg4: memref<1x128xf32, #tpu.memory_space<vmem>>, %arg5: memref<128x128xf32, #tpu.memory_space<vmem>>, %arg6: memref<1x128xf32, #tpu.memory_space<vmem>>, %arg7: memref<128x128xf32, #tpu.memory_space<vmem>>, %arg8: memref<128x128xf32, #tpu.memory_space<vmem>>) attributes {dimension_semantics = [#tpu.dimension_semantics<arbitrary>], iteration_bounds = array<i64: 1>, scalar_prefetch = 0 : i64, scratch_operands = 0 : i64, tpu.core_type = #tpu.core_type<tc>, window_params = [{pipeline_mode = #tpu.pipeline_mode<synchronous>, transform_indices = @transform_0, window_bounds = array<i64: 128, 128>}, {pipeline_mode = #tpu.pipeline_mode<synchronous>, transform_indices = @transform_1, window_bounds = array<i64: 128, 128>}, {pipeline_mode = #tpu.pipeline_mode<synchronous>, transform_indices = @transform_2, window_bounds = array<i64: 128, 128>}, {pipeline_mode = #tpu.pipeline_mode<synchronous>, transform_indices = @transform_3, window_bounds = array<i64: 1, 128>}, {pipeline_mode = #tpu.pipeline_mode<synchronous>, transform_indices = @transform_4, window_bounds = array<i64: 128, 128>}, {pipeline_mode = #tpu.pipeline_mode<synchronous>, transform_indices = @transform_5, window_bounds = array<i64: 1, 128>}, {pipeline_mode = #tpu.pipeline_mode<synchronous>, transform_indices = @transform_6, window_bounds = array<i64: 128, 128>}, {pipeline_mode = #tpu.pipeline_mode<synchronous>, transform_indices = @transform_7, window_bounds = array<i64: 128, 128>}]} {
    %c0 = arith.constant 0 : index
    %c0_0 = arith.constant 0 : index
    %0 = vector.load %arg1[%c0, %c0_0] : memref<128x128xf32, #tpu.memory_space<vmem>>, vector<128x128xf32>
    %c0_1 = arith.constant 0 : index
    %c0_2 = arith.constant 0 : index
    %1 = vector.load %arg3[%c0_1, %c0_2] : memref<128x128xf32, #tpu.memory_space<vmem>>, vector<128x128xf32>
    %cst = arith.constant dense<0.000000e+00> : vector<128x128xf32>
    %2 = tpu.matmul %0, %1, %cst {dimension_numbers = #tpu.dot_dimension_numbers<[1], [0], [0], [1], [0, 0, 1, 1], [], []>} : vector<128x128xf32>, vector<128x128xf32>, vector<128x128xf32> -> vector<128x128xf32>
    %c0_3 = arith.constant 0 : index
    %c0_4 = arith.constant 0 : index
    %3 = vector.load %arg4[%c0_3, %c0_4] : memref<1x128xf32, #tpu.memory_space<vmem>>, vector<1x128xf32>
    %4 = vector.broadcast %3 : vector<1x128xf32> to vector<128x128xf32>
    %5 = arith.addf %2, %4 : vector<128x128xf32>
    %cst_5 = arith.constant 1.000000e+00 : f32
    %6 = vector.broadcast %cst_5 : f32 to vector<128x128xf32>
    %7 = arith.mulf %6, %5 : vector<128x128xf32>
    %8 = math.tanh %7 : vector<128x128xf32>
    %c0_6 = arith.constant 0 : index
    %c0_7 = arith.constant 0 : index
    %9 = vector.load %arg7[%c0_6, %c0_7] : memref<128x128xf32, #tpu.memory_space<vmem>>, vector<128x128xf32>
    tpu.vector_store %arg7[%c0_6, %c0_7], %8 {strides = array<i32>} : memref<128x128xf32, #tpu.memory_space<vmem>>, vector<128x128xf32>,
    %c0_8 = arith.constant 0 : index
    %c0_9 = arith.constant 0 : index
    %10 = vector.load %arg2[%c0_8, %c0_9] : memref<128x128xf32, #tpu.memory_space<vmem>>, vector<128x128xf32>
    %c0_10 = arith.constant 0 : index
    %c0_11 = arith.constant 0 : index
    %11 = vector.load %arg5[%c0_10, %c0_11] : memref<128x128xf32, #tpu.memory_space<vmem>>, vector<128x128xf32>
    %cst_12 = arith.constant dense<0.000000e+00> : vector<128x128xf32>
    %12 = tpu.matmul %10, %11, %cst_12 {dimension_numbers = #tpu.dot_dimension_numbers<[1], [0], [0], [1], [0, 0, 1, 1], [], []>} : vector<128x128xf32>, vector<128x128xf32>, vector<128x128xf32> -> vector<128x128xf32>
    %c0_13 = arith.constant 0 : index
    %c0_14 = arith.constant 0 : index
    %13 = vector.load %arg6[%c0_13, %c0_14] : memref<1x128xf32, #tpu.memory_space<vmem>>, vector<1x128xf32>
    %14 = vector.broadcast %13 : vector<1x128xf32> to vector<128x128xf32>
    %15 = arith.addf %12, %14 : vector<128x128xf32>
    %cst_15 = arith.constant 1.000000e+00 : f32
    %16 = vector.broadcast %cst_15 : f32 to vector<128x128xf32>
    %17 = arith.mulf %16, %15 : vector<128x128xf32>
    %18 = math.tanh %17 : vector<128x128xf32>
    %c0_16 = arith.constant 0 : index
    %c0_17 = arith.constant 0 : index
    %19 = vector.load %arg8[%c0_16, %c0_17] : memref<128x128xf32, #tpu.memory_space<vmem>>, vector<128x128xf32>
    tpu.vector_store %arg8[%c0_16, %c0_17], %18 {strides = array<i32>} : memref<128x128xf32, #tpu.memory_space<vmem>>, vector<128x128xf32>,
    return
  }
  func.func @transform_0(%arg0: i32) -> (i32, i32) {
    %c0_i32 = arith.constant 0 : i32
    %c0_i32_0 = arith.constant 0 : i32
    %c0_i32_1 = arith.constant 0 : i32
    return %c0_i32, %c0_i32_0 : i32, i32
  }
  func.func @transform_1(%arg0: i32) -> (i32, i32) {
    %c0_i32 = arith.constant 0 : i32
    %c0_i32_0 = arith.constant 0 : i32
    %c0_i32_1 = arith.constant 0 : i32
    return %c0_i32, %c0_i32_0 : i32, i32
  }
  func.func @transform_2(%arg0: i32) -> (i32, i32) {
    %c0_i32 = arith.constant 0 : i32
    %c0_i32_0 = arith.constant 0 : i32
    %c0_i32_1 = arith.constant 0 : i32
    return %c0_i32, %c0_i32_0 : i32, i32
  }
  func.func @transform_3(%arg0: i32) -> (i32, i32) {
    %c0_i32 = arith.constant 0 : i32
    %c0_i32_0 = arith.constant 0 : i32
    %c0_i32_1 = arith.constant 0 : i32
    return %c0_i32, %c0_i32_0 : i32, i32
  }
  func.func @transform_4(%arg0: i32) -> (i32, i32) {
    %c0_i32 = arith.constant 0 : i32
    %c0_i32_0 = arith.constant 0 : i32
    %c0_i32_1 = arith.constant 0 : i32
    return %c0_i32, %c0_i32_0 : i32, i32
  }
  func.func @transform_5(%arg0: i32) -> (i32, i32) {
    %c0_i32 = arith.constant 0 : i32
    %c0_i32_0 = arith.constant 0 : i32
    %c0_i32_1 = arith.constant 0 : i32
    return %c0_i32, %c0_i32_0 : i32, i32
  }
  func.func @transform_6(%arg0: i32) -> (i32, i32) {
    %c0_i32 = arith.constant 0 : i32
    %c0_i32_0 = arith.constant 0 : i32
    %c0_i32_1 = arith.constant 0 : i32
    return %c0_i32, %c0_i32_0 : i32, i32
  }
  func.func @transform_7(%arg0: i32) -> (i32, i32) {
    %c0_i32 = arith.constant 0 : i32
    %c0_i32_0 = arith.constant 0 : i32
    %c0_i32_1 = arith.constant 0 : i32
    return %c0_i32, %c0_i32_0 : i32, i32
  }
}

</mosaic_0001>

<bundles_post_ra>
// kernel: tpu_custom_call.1
= control target key start
LH: loop header
LB: loop body
LE: loop exit
PB: predicated region body
PF: predicated region fallthrough
CT: control target
= control target key end

     0   :  { %13 = vsyncpa [#allocation3], 0  ;;  %s1206_s0 = inlined_call_operand.hbm [shape: f32[128,128], index: 0, kind: input, shape index: {}]   ;;  %s1207_s1 = inlined_call_operand.hbm [shape: f32[128,128], index: 1, kind: input, shape index: {}]   ;;  %s1208_s2 = inlined_call_operand.hbm [shape: f32[128,128], index: 2, kind: input, shape index: {}]   ;;  %s1209_s3 = inlined_call_operand.vmem [shape: f32[1,128], index: 3, kind: input, shape index: {}]   ;;  %s1210_s4 = inlined_call_operand.hbm [shape: f32[128,128], index: 4, kind: input, shape index: {}]   ;;  %s1211_s5 = inlined_call_operand.vmem [shape: f32[1,128], index: 5, kind: input, shape index: {}]   ;;  %s1212_s6 = inlined_call_operand.hbm [shape: f32[128,128], index: 6, kind: output, shape index: {0}]   ;;  %s1213_s7 = inlined_call_operand.hbm [shape: f32[128,128], index: 7, kind: output, shape index: {1}]  }
   0x1   :  { %14 = vsyncpa [#allocation6], 0 }
   0x2   :  { %15 = vsyncpa [#allocation9], 0 }
   0x3   :  { %16 = vsyncpa [#allocation4], 0 }
   0x4   :  { %17 = vsyncpa [#allocation12], 0  ;;  %s1005_s24 = smov [#allocation5]   ;;  %s1006_s26 = smov [#allocation2]  }
   0x5   :  { %s35_s25 = sshll.u32 %s1005_s24, 4  ;;  %s23_s27 = sshll.u32 %s1006_s26, 4  ;;  %s36_s25 = int_to_ptr.vmem [resolvable:$true] %s35_s25  ;;  %s1053_s27 = int_to_ptr.vmem [resolvable:$true] %s23_s27 }
   0x6   :  { %s863_s30 = scalar_lea.hbm %s1207_s1, 2048 }
   0x7   :  { %p864_p0 = scmp.ne.s32.totalorder %s1207_s1, %s863_s30  ;;  %p867_p1 = scmp.lt.u32.totalorder %s863_s30, %s1207_s1 }
   0x9   :  { %p869_p2 = pnand %p867_p1, %p864_p0 }
   0xb   :  { %872 = shalt.err (!%p869_p2)
}
   0xc   :  { %s873_s12 = scalar_lea.vmem %s36_s25, 2048  ;;  %p878_p4 = scmp.lt.s32.totalorder %s36_s25, %s36_s25 }
   0xd   :  { %p874_p3 = scmp.ne.s32.totalorder %s36_s25, %s873_s12  ;;  %p879_p5 = scmp.lt.s32.totalorder %s873_s12, %s873_s12 }
   0xf   :  { %p880_p6 = por %p879_p5, %p878_p4 }
  0x11   :  { %p881_p7 = pnand %p880_p6, %p874_p3 }
  0x13   :  { %884 = shalt.err (!%p881_p7)
}
  0x14   :  { %s1007_s13 = smov 128   ;;  %s1008_s14 = smov 8  }
  0x15   :  { %41 = dma.hbm_to_vmem [thread:$0]  %s1207_s1, 2048, %s36_s25, [#allocation6], %s1007_s13, %s1007_s13, %s1008_s14  }
  0x16   :  { %s885_s19 = scalar_lea.hbm %s1206_s0, 2048 }
  0x17   :  { %p886_p8 = scmp.ne.s32.totalorder %s1206_s0, %s885_s19  ;;  %p889_p9 = scmp.lt.u32.totalorder %s885_s19, %s1206_s0 }
  0x19   :  { %p891_p10 = pnand %p889_p9, %p886_p8 }
  0x1b   :  { %894 = shalt.err (!%p891_p10)
}
  0x1c   :  { %s895_s24 = scalar_lea.vmem %s1053_s27, 2048  ;;  %p900_p12 = scmp.lt.s32.totalorder %s1053_s27, %s1053_s27 }
  0x1d   :  { %p896_p11 = scmp.ne.s32.totalorder %s1053_s27, %s895_s24  ;;  %p901_p13 = scmp.lt.s32.totalorder %s895_s24, %s895_s24 }
  0x1f   :  { %p902_p0 = por %p901_p13, %p900_p12 }
  0x21   :  { %p903_p1 = pnand %p902_p0, %p896_p11 }
  0x23   :  { %906 = shalt.err (!%p903_p1)
}
  0x24   :  { %29 = dma.hbm_to_vmem [thread:$0]  %s1206_s0, 2048, %s1053_s27, [#allocation3], %s1007_s13, %s1007_s13, %s1008_s14  }
  0x25   :  { %s1009_s26 = smov [#allocation7]   ;;  %s1010_s29 = smov [#allocation8]  }
  0x26   :  { %s47_s28 = sshll.u32 %s1009_s26, 4  ;;  %s61_s30 = sshll.u32 %s1010_s29, 4  ;;  %s48_s28 = int_to_ptr.vmem [resolvable:$true] %s47_s28  ;;  %s1090_s30 = int_to_ptr.vmem [resolvable:$true] %s61_s30 }
  0x27   :  { %s907_s10 = scalar_lea.hbm %s1208_s2, 2048 }
  0x28   :  { %p908_p2 = scmp.ne.s32.totalorder %s1208_s2, %s907_s10  ;;  %p911_p3 = scmp.lt.u32.totalorder %s907_s10, %s1208_s2 }
  0x2a   :  { %p913_p4 = pnand %p911_p3, %p908_p2 }
  0x2c   :  { %916 = shalt.err (!%p913_p4)
}
  0x2d   :  { %s917_s0 = scalar_lea.vmem %s48_s28, 2048  ;;  %p922_p6 = scmp.lt.s32.totalorder %s48_s28, %s48_s28 }
  0x2e   :  { %p918_p5 = scmp.ne.s32.totalorder %s48_s28, %s917_s0  ;;  %p923_p7 = scmp.lt.s32.totalorder %s917_s0, %s917_s0 }
  0x30   :  { %p924_p8 = por %p923_p7, %p922_p6 }
  0x32   :  { %p925_p9 = pnand %p924_p8, %p918_p5 }
  0x34   :  { %928 = shalt.err (!%p925_p9)
}
  0x35   :  { %53 = dma.hbm_to_vmem [thread:$0]  %s1208_s2, 2048, %s48_s28, [#allocation6], %s1007_s13, %s1007_s13, %s1008_s14  }
  0x36   :  { %s929_s20 = scalar_lea.hbm %s1210_s4, 2048 }
  0x37   :  { %p930_p10 = scmp.ne.s32.totalorder %s1210_s4, %s929_s20  ;;  %p933_p11 = scmp.lt.u32.totalorder %s929_s20, %s1210_s4 }
  0x39   :  { %p935_p12 = pnand %p933_p11, %p930_p10 }
  0x3b   :  { %938 = shalt.err (!%p935_p12)
}
  0x3c   :  { %s939_s1 = scalar_lea.vmem %s1090_s30, 2048  ;;  %p944_p0 = scmp.lt.s32.totalorder %s1090_s30, %s1090_s30 }
  0x3d   :  { %p940_p13 = scmp.ne.s32.totalorder %s1090_s30, %s939_s1  ;;  %p945_p1 = scmp.lt.s32.totalorder %s939_s1, %s939_s1 }
  0x3f   :  { %p946_p2 = por %p945_p1, %p944_p0 }
  0x41   :  { %p947_p3 = pnand %p946_p2, %p940_p13 }
  0x43   :  { %950 = shalt.err (!%p947_p3)
}
  0x44   :  { %67 = dma.hbm_to_vmem [thread:$0]  %s1210_s4, 2048, %s1090_s30, [#allocation9], %s1007_s13, %s1007_s13, %s1008_s14  }
  0x45   :  { %995 = dma.done.wait [#allocation3], 2048  }
  0x46   :  { %996 = vsyncadd [#allocation3], 4294965248 }
  0x47   :  { %997 = dma.done.wait [#allocation6], 4096  }
  0x48   :  { %998 = vsyncadd [#allocation6], 4294963200 }
  0x49   :  { %999 = dma.done.wait [#allocation9], 2048  }
  0x4a   :  { %1000 = vsyncadd [#allocation9], 4294965248  ;;  %v98_v0 = vld [vmem:[#allocation7] sm:$0xff]  ;;  %v99_v1 = vld [vmem:[#allocation7 + $0x8] sm:$0xff]  ;;  %s1012_s30 = smov [#allocation11]  }
  0x4b   :  { %v314_v2 = vld [vmem:[#allocation8] sm:$0xff]  ;;  %v727_v3 = vpack.c.bf16 %v99_v1, %v98_v0  ;;  %v315_v4 = vld [vmem:[#allocation8 + $0x8] sm:$0xff]  ;;  %v100_v5 = vld [vmem:[#allocation7 + $0x10] sm:$0xff]  ;;  %s531_s8 = sshll.u32 %s1012_s30, 4  ;;  %s1169_s8 = int_to_ptr.vmem [resolvable:$true] %s531_s8 }
  0x4c   :  { %v101_v6 = vld [vmem:[#allocation7 + $0x18] sm:$0xff]  ;;  %v759_v7 = vpack.c.bf16 %v315_v4, %v314_v2  ;;  %v316_v9 = vld [vmem:[#allocation8 + $0x10] sm:$0xff]  ;;  %v102_v11 = vld [vmem:[#allocation7 + $0x20] sm:$0xff] }
  0x4d   :  { %v731_v8 = vpack.c.bf16 %v101_v6, %v100_v5  ;;  %v317_v10 = vld [vmem:[#allocation8 + $0x18] sm:$0xff]  ;;  %728 = vmatprep.subr.bf16.mxu0 %v727_v3  ;;  %v103_v13 = vld [vmem:[#allocation7 + $0x28] sm:$0xff]  ;;  %v318_v14 = vld [vmem:[#allocation8 + $0x20] sm:$0xff] }
  0x4e   :  { %v763_v12 = vpack.c.bf16 %v317_v10, %v316_v9  ;;  %v319_v15 = vld [vmem:[#allocation8 + $0x28] sm:$0xff]  ;;  %760 = vmatprep.subr.bf16.mxu1 %v759_v7  ;;  %730 = vmatpush3.bf16.msra.mxu0 %v727_v3  ;;  %v735_v16 = vpack.c.bf16 %v103_v13, %v102_v11  ;;  %v104_v18 = vld [vmem:[#allocation7 + $0x30] sm:$0xff]  ;;  %v105_v19 = vld [vmem:[#allocation7 + $0x38] sm:$0xff] }
  0x4f   :  { %762 = vmatpush3.bf16.msra.mxu1 %v759_v7  ;;  %732 = vmatprep.subr.bf16.mxu0 %v731_v8  ;;  %v767_v17 = vpack.c.bf16 %v319_v15, %v318_v14  ;;  %v320_v20 = vld [vmem:[#allocation8 + $0x30] sm:$0xff]  ;;  %v321_v21 = vld [vmem:[#allocation8 + $0x38] sm:$0xff]  ;;  %v739_v22 = vpack.c.bf16 %v105_v19, %v104_v18  ;;  %v106_v24 = vld [vmem:[#allocation7 + $0x40] sm:$0xff] }
  0x50   :  { %764 = vmatprep.subr.bf16.mxu1 %v763_v12  ;;  %v771_v23 = vpack.c.bf16 %v321_v21, %v320_v20  ;;  %v107_v25 = vld [vmem:[#allocation7 + $0x48] sm:$0xff]  ;;  %v82_v26 = vld [vmem:[#allocation2] sm:$0xff]  ;;  %v108_v32 = vld [vmem:[#allocation7 + $0x50] sm:$0xff] }
  0x51   :  { %v322_v27 = vld [vmem:[#allocation8 + $0x40] sm:$0xff]  ;;  %v323_v28 = vld [vmem:[#allocation8 + $0x48] sm:$0xff]  ;;  %647 = vmatprep.mubr.f32.mxu0 %v82_v26  ;;  %v743_v30 = vpack.c.bf16 %v107_v25, %v106_v24  ;;  %v109_v33 = vld [vmem:[#allocation7 + $0x58] sm:$0xff] }
  0x52   :  { %734 = vmatpush3.bf16.msra.mxu0 %v731_v8  ;;  %v298_v29 = vld [vmem:[#allocation5] sm:$0xff]  ;;  %v775_v31 = vpack.c.bf16 %v323_v28, %v322_v27  ;;  %v324_v34 = vld [vmem:[#allocation8 + $0x50] sm:$0xff]  ;;  %v325_v35 = vld [vmem:[#allocation8 + $0x58] sm:$0xff]  ;;  %v747_v36 = vpack.c.bf16 %v109_v33, %v108_v32 }
  0x53   :  { %766 = vmatpush3.bf16.msra.mxu1 %v763_v12  ;;  %736 = vmatprep.subr.bf16.mxu0 %v735_v16  ;;  %v779_v37 = vpack.c.bf16 %v325_v35, %v324_v34  ;;  %v110_v38 = vld [vmem:[#allocation7 + $0x60] sm:$0xff]  ;;  %v111_v39 = vld [vmem:[#allocation7 + $0x68] sm:$0xff]  ;;  %v112_v44 = vld [vmem:[#allocation7 + $0x70] sm:$0xff] }
  0x54   :  { %768 = vmatprep.subr.bf16.mxu1 %v767_v17  ;;  %703 = vmatprep.mubr.f32.mxu1 %v298_v29  ;;  %v326_v40 = vld [vmem:[#allocation8 + $0x60] sm:$0xff]  ;;  %v327_v41 = vld [vmem:[#allocation8 + $0x68] sm:$0xff]  ;;  %v751_v42 = vpack.c.bf16 %v111_v39, %v110_v38  ;;  %v113_v45 = vld [vmem:[#allocation7 + $0x78] sm:$0xff] }
  0x55   :  { %v783_v43 = vpack.c.bf16 %v327_v41, %v326_v40  ;;  %v328_v46 = vld [vmem:[#allocation8 + $0x70] sm:$0xff]  ;;  %v329_v47 = vld [vmem:[#allocation8 + $0x78] sm:$0xff]  ;;  %v755_v48 = vpack.c.bf16 %v113_v45, %v112_v44  ;;  %v83_v50 = vld [vmem:[#allocation2 + $0x8] sm:$0xff] }
  0x56   :  { %738 = vmatpush3.bf16.msra.mxu0 %v735_v16  ;;  %v787_v49 = vpack.c.bf16 %v329_v47, %v328_v46  ;;  %v299_v51 = vld [vmem:[#allocation5 + $0x8] sm:$0xff]  ;;  %v84_v52 = vld [vmem:[#allocation2 + $0x10] sm:$0xff]  ;;  %v85_v54 = vld [vmem:[#allocation2 + $0x18] sm:$0xff] }
  0x57   :  { %770 = vmatpush3.bf16.msra.mxu1 %v767_v17  ;;  %740 = vmatprep.subr.bf16.mxu0 %v739_v22  ;;  %v300_v53 = vld [vmem:[#allocation5 + $0x10] sm:$0xff]  ;;  %v301_v55 = vld [vmem:[#allocation5 + $0x18] sm:$0xff]  ;;  %v86_v56 = vld [vmem:[#allocation2 + $0x20] sm:$0xff] }
  0x58   :  { %772 = vmatprep.subr.bf16.mxu1 %v771_v23  ;;  %v302_v57 = vld [vmem:[#allocation5 + $0x20] sm:$0xff]  ;;  %v87_v58 = vld [vmem:[#allocation2 + $0x28] sm:$0xff]  ;;  %v88_v60 = vld [vmem:[#allocation2 + $0x30] sm:$0xff] }
  0x59   :  { %v303_v59 = vld [vmem:[#allocation5 + $0x28] sm:$0xff]  ;;  %v304_v61 = vld [vmem:[#allocation5 + $0x30] sm:$0xff]  ;;  %v89_v62 = vld [vmem:[#allocation2 + $0x38] sm:$0xff] }
  0x5a   :  { %742 = vmatpush3.bf16.msra.mxu0 %v739_v22  ;;  %v305_v63 = vld [vmem:[#allocation5 + $0x38] sm:$0xff]  ;;  %v90_v0 = vld [vmem:[#allocation2 + $0x40] sm:$0xff]  ;;  %v91_v2 = vld [vmem:[#allocation2 + $0x48] sm:$0xff] }
  0x5b   :  { %774 = vmatpush3.bf16.msra.mxu1 %v771_v23  ;;  %744 = vmatprep.subr.bf16.mxu0 %v743_v30  ;;  %v306_v1 = vld [vmem:[#allocation5 + $0x40] sm:$0xff]  ;;  %v307_v3 = vld [vmem:[#allocation5 + $0x48] sm:$0xff]  ;;  %v92_v4 = vld [vmem:[#allocation2 + $0x50] sm:$0xff] }
  0x5c   :  { %776 = vmatprep.subr.bf16.mxu1 %v775_v31  ;;  %v308_v5 = vld [vmem:[#allocation5 + $0x50] sm:$0xff]  ;;  %v93_v6 = vld [vmem:[#allocation2 + $0x58] sm:$0xff]  ;;  %v94_v8 = vld [vmem:[#allocation2 + $0x60] sm:$0xff] }
  0x5d   :  { %v309_v7 = vld [vmem:[#allocation5 + $0x58] sm:$0xff]  ;;  %v310_v9 = vld [vmem:[#allocation5 + $0x60] sm:$0xff]  ;;  %v95_v10 = vld [vmem:[#allocation2 + $0x68] sm:$0xff] }
  0x5e   :  { %746 = vmatpush3.bf16.msra.mxu0 %v743_v30  ;;  %v311_v11 = vld [vmem:[#allocation5 + $0x68] sm:$0xff]  ;;  %v96_v12 = vld [vmem:[#allocation2 + $0x70] sm:$0xff]  ;;  %v97_v14 = vld [vmem:[#allocation2 + $0x78] sm:$0xff] }
  0x5f   :  { %778 = vmatpush3.bf16.msra.mxu1 %v775_v31  ;;  %748 = vmatprep.subr.bf16.mxu0 %v747_v36  ;;  %v312_v13 = vld [vmem:[#allocation5 + $0x70] sm:$0xff]  ;;  %v313_v15 = vld [vmem:[#allocation5 + $0x78] sm:$0xff]  ;;  %v1130_v16 = vld [vmem:[%s1209_s3] ss:$0 sm:$0xff]  ;;  %s1011_s3 = smov [#allocation10]  }
  0x60   :  { %780 = vmatprep.subr.bf16.mxu1 %v779_v37  ;;  %v1135_v17 = vld [vmem:[%s1211_s5] ss:$0 sm:$0xff]  ;;  %s519_s5 = sshll.u32 %s1011_s3, 4  ;;  %s520_s5 = int_to_ptr.vmem [resolvable:$true] %s519_s5 }
  0x61   :  { %s951_s9 = scalar_lea.vmem %s520_s5, 2048  ;;  %p956_p5 = scmp.lt.s32.totalorder %s520_s5, %s520_s5 }
  0x62   :  { %750 = vmatpush3.bf16.msra.mxu0 %v747_v36  ;;  %p952_p4 = scmp.ne.s32.totalorder %s520_s5, %s951_s9  ;;  %p957_p6 = scmp.lt.s32.totalorder %s951_s9, %s951_s9 }
  0x63   :  { %782 = vmatpush3.bf16.msra.mxu1 %v779_v37  ;;  %752 = vmatprep.subr.bf16.mxu0 %v751_v42 }
  0x64   :  { %784 = vmatprep.subr.bf16.mxu1 %v783_v43  ;;  %p958_p7 = por %p957_p6, %p956_p5 }
  0x66   :  { %754 = vmatpush3.bf16.msra.mxu0 %v751_v42  ;;  %p959_p8 = pnand %p958_p7, %p952_p4 }
  0x67   :  { %786 = vmatpush3.bf16.msra.mxu1 %v783_v43  ;;  %756 = vmatprep.subr.bf16.mxu0 %v755_v48 }
  0x68   :  { %788 = vmatprep.subr.bf16.mxu1 %v787_v49 }
  0x6a   :  { %758 = vmatpush3.bf16.msra.mxu0 %v755_v48 }
  0x6b   :  { %790 = vmatpush3.bf16.msra.mxu1 %v787_v49 }
  0x6d   :  { %648 = vmatmul.mubr.f32.vlgmr.msra.gmra.mrb[0].mxu0 %v83_v50 }
  0x6e   :  { %704 = vmatmul.mubr.f32.vlgmr.msra.gmra.mrb[0].mxu1 %v299_v51  ;;  %650 = vmatprep.mubr.f32.mxu0 %v84_v52 }
  0x6f   :  { %706 = vmatprep.mubr.f32.mxu1 %v300_v53 }
  0x71   :  { %651 = vmatmul.mubr.f32.gmra.mrb[2].mxu0 %v85_v54 }
  0x72   :  { %707 = vmatmul.mubr.f32.gmra.mrb[2].mxu1 %v301_v55  ;;  %653 = vmatprep.mubr.f32.mxu0 %v86_v56 }
  0x73   :  { %709 = vmatprep.mubr.f32.mxu1 %v302_v57 }
  0x75   :  { %654 = vmatmul.mubr.f32.gmra.mrb[4].mxu0 %v87_v58 }
  0x76   :  { %710 = vmatmul.mubr.f32.gmra.mrb[4].mxu1 %v303_v59  ;;  %656 = vmatprep.mubr.f32.mxu0 %v88_v60 }
  0x77   :  { %712 = vmatprep.mubr.f32.mxu1 %v304_v61 }
  0x79   :  { %657 = vmatmul.mubr.f32.gmra.mrb[6].mxu0 %v89_v62 }
  0x7a   :  { %713 = vmatmul.mubr.f32.gmra.mrb[6].mxu1 %v305_v63  ;;  %659 = vmatprep.mubr.f32.mxu0 %v90_v0 }
  0x7b   :  { %715 = vmatprep.mubr.f32.mxu1 %v306_v1 }
  0x7d   :  { %660 = vmatmul.mubr.f32.gmra.mrb[8].mxu0 %v91_v2 }
  0x7e   :  { %716 = vmatmul.mubr.f32.gmra.mrb[8].mxu1 %v307_v3  ;;  %662 = vmatprep.mubr.f32.mxu0 %v92_v4 }
  0x7f   :  { %718 = vmatprep.mubr.f32.mxu1 %v308_v5 }
  0x81   :  { %663 = vmatmul.mubr.f32.gmra.mrb[10].mxu0 %v93_v6 }
  0x82   :  { %719 = vmatmul.mubr.f32.gmra.mrb[10].mxu1 %v309_v7  ;;  %665 = vmatprep.mubr.f32.mxu0 %v94_v8 }
  0x83   :  { %721 = vmatprep.mubr.f32.mxu1 %v310_v9 }
  0x85   :  { %666 = vmatmul.mubr.f32.gmra.mrb[12].mxu0 %v95_v10 }
  0x86   :  { %722 = vmatmul.mubr.f32.gmra.mrb[12].mxu1 %v311_v11  ;;  %668 = vmatprep.mubr.f32.mxu0 %v96_v12 }
  0x87   :  { %724 = vmatprep.mubr.f32.mxu1 %v312_v13 }
  0x89   :  { %669 = vmatmul.mubr.f32.gmra.mrb[14].mxu0 %v97_v14 }
  0x8a   :  { %725 = vmatmul.mubr.f32.gmra.mrb[14].mxu1 %v313_v15 }
 0x140   :  { %v649_v18 = vpop.f32.mrb[0].mxu0 }
 0x141   :  { %v193_v19 = vadd.f32 %v649_v18, %v1130_v16  ;;  %v705_v20 = vpop.f32.mrb[0].mxu1  ;;  %v187_v21 = vpop.f32.mrb[1].mxu0 }
 0x142   :  { %v409_v22 = vadd.f32 %v705_v20, %v1135_v17  ;;  %v188_v23 = vadd.f32 %v1130_v16, %v187_v21  ;;  %v403_v24 = vpop.f32.mrb[1].mxu1 }
 0x143   :  { %799 = vtanh.f32 %v193_v19  ;;  %v404_v25 = vadd.f32 %v1135_v17, %v403_v24 }
 0x144   :  { %801 = vtanh.f32 %v409_v22  ;;  %v652_v26 = vpop.f32.mrb[2].mxu0 }
 0x145   :  { %803 = vtanh.f32 %v188_v23  ;;  %v203_v27 = vadd.f32 %v652_v26, %v1130_v16  ;;  %v708_v28 = vpop.f32.mrb[2].mxu1  ;;  %v197_v29 = vpop.f32.mrb[3].mxu0 }
 0x146   :  { %805 = vtanh.f32 %v404_v25  ;;  %v419_v30 = vadd.f32 %v708_v28, %v1135_v17  ;;  %v198_v31 = vadd.f32 %v1130_v16, %v197_v29  ;;  %v413_v32 = vpop.f32.mrb[3].mxu1 }
 0x147   :  { %807 = vtanh.f32 %v203_v27  ;;  %v414_v33 = vadd.f32 %v1135_v17, %v413_v32 }
 0x148   :  { %809 = vtanh.f32 %v419_v30  ;;  %v655_v34 = vpop.f32.mrb[4].mxu0 }
 0x149   :  { %811 = vtanh.f32 %v198_v31  ;;  %v213_v35 = vadd.f32 %v655_v34, %v1130_v16  ;;  %v711_v36 = vpop.f32.mrb[4].mxu1  ;;  %v207_v37 = vpop.f32.mrb[5].mxu0 }
 0x14a   :  { %813 = vtanh.f32 %v414_v33  ;;  %v429_v38 = vadd.f32 %v711_v36, %v1135_v17  ;;  %v208_v39 = vadd.f32 %v1130_v16, %v207_v37  ;;  %v423_v40 = vpop.f32.mrb[5].mxu1 }
 0x14b   :  { %815 = vtanh.f32 %v213_v35  ;;  %v424_v41 = vadd.f32 %v1135_v17, %v423_v40 }
 0x14c   :  { %817 = vtanh.f32 %v429_v38  ;;  %v658_v42 = vpop.f32.mrb[6].mxu0 }
 0x14d   :  { %v800_v43 = vpop.eup %799  ;;  %819 = vtanh.f32 %v208_v39  ;;  %v223_v44 = vadd.f32 %v658_v42, %v1130_v16  ;;  %v714_v45 = vpop.f32.mrb[6].mxu1 }
 0x14e   :  { %v217_v46 = vpop.f32.mrb[7].mxu0  ;;  %v802_v47 = vpop.eup %801  ;;  %283 = vst [vmem:[#allocation10 + $0x8] sm:$0xff] %v800_v43  ;;  %821 = vtanh.f32 %v424_v41  ;;  %v439_v48 = vadd.f32 %v714_v45, %v1135_v17 }
 0x14f   :  { %v218_v49 = vadd.f32 %v1130_v16, %v217_v46  ;;  %v433_v50 = vpop.f32.mrb[7].mxu1  ;;  %v804_v51 = vpop.eup %803  ;;  %499 = vst [vmem:[#allocation11 + $0x8] sm:$0xff] %v802_v47  ;;  %823 = vtanh.f32 %v223_v44 }
 0x150   :  { %v434_v52 = vadd.f32 %v1135_v17, %v433_v50  ;;  %v806_v53 = vpop.eup %805  ;;  %282 = vst [vmem:[#allocation10] sm:$0xff] %v804_v51  ;;  %825 = vtanh.f32 %v439_v48  ;;  %v661_v54 = vpop.f32.mrb[8].mxu0 }
 0x151   :  { %v808_v55 = vpop.eup %807  ;;  %498 = vst [vmem:[#allocation11] sm:$0xff] %v806_v53  ;;  %827 = vtanh.f32 %v218_v49  ;;  %v233_v56 = vadd.f32 %v661_v54, %v1130_v16  ;;  %v717_v57 = vpop.f32.mrb[8].mxu1 }
 0x152   :  { %v227_v58 = vpop.f32.mrb[9].mxu0  ;;  %v810_v59 = vpop.eup %809  ;;  %285 = vst [vmem:[#allocation10 + $0x18] sm:$0xff] %v808_v55  ;;  %829 = vtanh.f32 %v434_v52  ;;  %v449_v60 = vadd.f32 %v717_v57, %v1135_v17 }
 0x153   :  { %v228_v61 = vadd.f32 %v1130_v16, %v227_v58  ;;  %v443_v62 = vpop.f32.mrb[9].mxu1  ;;  %v812_v63 = vpop.eup %811  ;;  %501 = vst [vmem:[#allocation11 + $0x18] sm:$0xff] %v810_v59  ;;  %831 = vtanh.f32 %v233_v56 }
 0x154   :  { %v444_v0 = vadd.f32 %v1135_v17, %v443_v62  ;;  %v814_v1 = vpop.eup %813  ;;  %284 = vst [vmem:[#allocation10 + $0x10] sm:$0xff] %v812_v63  ;;  %833 = vtanh.f32 %v449_v60  ;;  %v664_v2 = vpop.f32.mrb[10].mxu0 }
 0x155   :  { %v816_v3 = vpop.eup %815  ;;  %500 = vst [vmem:[#allocation11 + $0x10] sm:$0xff] %v814_v1  ;;  %835 = vtanh.f32 %v228_v61  ;;  %v243_v4 = vadd.f32 %v664_v2, %v1130_v16  ;;  %v720_v5 = vpop.f32.mrb[10].mxu1 }
 0x156   :  { %v237_v6 = vpop.f32.mrb[11].mxu0  ;;  %v818_v7 = vpop.eup %817  ;;  %287 = vst [vmem:[#allocation10 + $0x28] sm:$0xff] %v816_v3  ;;  %837 = vtanh.f32 %v444_v0  ;;  %v459_v8 = vadd.f32 %v720_v5, %v1135_v17 }
 0x157   :  { %v238_v9 = vadd.f32 %v1130_v16, %v237_v6  ;;  %v453_v10 = vpop.f32.mrb[11].mxu1  ;;  %v820_v11 = vpop.eup %819  ;;  %503 = vst [vmem:[#allocation11 + $0x28] sm:$0xff] %v818_v7  ;;  %839 = vtanh.f32 %v243_v4 }
 0x158   :  { %v454_v12 = vadd.f32 %v1135_v17, %v453_v10  ;;  %v822_v13 = vpop.eup %821  ;;  %286 = vst [vmem:[#allocation10 + $0x20] sm:$0xff] %v820_v11  ;;  %841 = vtanh.f32 %v459_v8  ;;  %v667_v14 = vpop.f32.mrb[12].mxu0 }
 0x159   :  { %v824_v15 = vpop.eup %823  ;;  %502 = vst [vmem:[#allocation11 + $0x20] sm:$0xff] %v822_v13  ;;  %843 = vtanh.f32 %v238_v9  ;;  %v253_v18 = vadd.f32 %v667_v14, %v1130_v16  ;;  %v723_v19 = vpop.f32.mrb[12].mxu1 }
 0x15a   :  { %v247_v20 = vpop.f32.mrb[13].mxu0  ;;  %v826_v21 = vpop.eup %825  ;;  %289 = vst [vmem:[#allocation10 + $0x38] sm:$0xff] %v824_v15  ;;  %845 = vtanh.f32 %v454_v12  ;;  %v469_v22 = vadd.f32 %v723_v19, %v1135_v17 }
 0x15b   :  { %v248_v23 = vadd.f32 %v1130_v16, %v247_v20  ;;  %v463_v24 = vpop.f32.mrb[13].mxu1  ;;  %v828_v25 = vpop.eup %827  ;;  %505 = vst [vmem:[#allocation11 + $0x38] sm:$0xff] %v826_v21  ;;  %847 = vtanh.f32 %v253_v18 }
 0x15c   :  { %v464_v26 = vadd.f32 %v1135_v17, %v463_v24  ;;  %v830_v27 = vpop.eup %829  ;;  %288 = vst [vmem:[#allocation10 + $0x30] sm:$0xff] %v828_v25  ;;  %849 = vtanh.f32 %v469_v22  ;;  %v670_v28 = vpop.f32.mrb[14].mxu0 }
 0x15d   :  { %v832_v29 = vpop.eup %831  ;;  %504 = vst [vmem:[#allocation11 + $0x30] sm:$0xff] %v830_v27  ;;  %851 = vtanh.f32 %v248_v23  ;;  %v263_v30 = vadd.f32 %v670_v28, %v1130_v16  ;;  %v726_v31 = vpop.f32.mrb[14].mxu1 }
 0x15e   :  { %v257_v32 = vpop.f32.mrb[15].mxu0  ;;  %v834_v33 = vpop.eup %833  ;;  %291 = vst [vmem:[#allocation10 + $0x48] sm:$0xff] %v832_v29  ;;  %853 = vtanh.f32 %v464_v26  ;;  %v479_v34 = vadd.f32 %v726_v31, %v1135_v17 }
 0x15f   :  { %v258_v35 = vadd.f32 %v1130_v16, %v257_v32  ;;  %v473_v36 = vpop.f32.mrb[15].mxu1  ;;  %v836_v37 = vpop.eup %835  ;;  %507 = vst [vmem:[#allocation11 + $0x48] sm:$0xff] %v834_v33  ;;  %855 = vtanh.f32 %v263_v30 }
 0x160   :  { %v474_v38 = vadd.f32 %v1135_v17, %v473_v36  ;;  %v838_v39 = vpop.eup %837  ;;  %290 = vst [vmem:[#allocation10 + $0x40] sm:$0xff] %v836_v37  ;;  %857 = vtanh.f32 %v479_v34 }
 0x161   :  { %v840_v40 = vpop.eup %839  ;;  %506 = vst [vmem:[#allocation11 + $0x40] sm:$0xff] %v838_v39  ;;  %859 = vtanh.f32 %v258_v35 }
 0x162   :  { %v842_v41 = vpop.eup %841  ;;  %293 = vst [vmem:[#allocation10 + $0x58] sm:$0xff] %v840_v40  ;;  %861 = vtanh.f32 %v474_v38 }
 0x163   :  { %v844_v42 = vpop.eup %843  ;;  %509 = vst [vmem:[#allocation11 + $0x58] sm:$0xff] %v842_v41 }
 0x164   :  { %v846_v43 = vpop.eup %845  ;;  %292 = vst [vmem:[#allocation10 + $0x50] sm:$0xff] %v844_v42 }
 0x165   :  { %v848_v16 = vpop.eup %847  ;;  %508 = vst [vmem:[#allocation11 + $0x50] sm:$0xff] %v846_v43 }
 0x166   :  { %v850_v44 = vpop.eup %849  ;;  %295 = vst [vmem:[#allocation10 + $0x68] sm:$0xff] %v848_v16 }
 0x167   :  { %v852_v45 = vpop.eup %851  ;;  %511 = vst [vmem:[#allocation11 + $0x68] sm:$0xff] %v850_v44 }
 0x168   :  { %v854_v17 = vpop.eup %853  ;;  %294 = vst [vmem:[#allocation10 + $0x60] sm:$0xff] %v852_v45 }
 0x169   :  { %v856_v46 = vpop.eup %855  ;;  %510 = vst [vmem:[#allocation11 + $0x60] sm:$0xff] %v854_v17 }
 0x16a   :  { %v858_v47 = vpop.eup %857  ;;  %297 = vst [vmem:[#allocation10 + $0x78] sm:$0xff] %v856_v46 }
 0x16b   :  { %v860_v48 = vpop.eup %859  ;;  %513 = vst [vmem:[#allocation11 + $0x78] sm:$0xff] %v858_v47 }
 0x16c   :  { %v862_v49 = vpop.eup %861  ;;  %296 = vst [vmem:[#allocation10 + $0x70] sm:$0xff] %v860_v48 }
 0x16d   :  { %512 = vst [vmem:[#allocation11 + $0x70] sm:$0xff] %v862_v49 }
 0x16e   :  { %962 = shalt.err (!%p959_p8)
}
 0x16f   :  { %s963_s12 = scalar_lea.hbm %s1212_s6, 2048 }
 0x170   :  { %p964_p9 = scmp.ne.s32.totalorder %s1212_s6, %s963_s12  ;;  %p967_p10 = scmp.lt.u32.totalorder %s963_s12, %s1212_s6 }
 0x172   :  { %p969_p11 = pnand %p967_p10, %p964_p9 }
 0x174   :  { %972 = shalt.err (!%p969_p11)
}
 0x175   :  { %525 = dma.vmem_to_hbm [thread:$0]  %s520_s5, 2048, %s1212_s6, [#allocation4], %s1007_s13, %s1007_s13, %s1008_s14  }
 0x176   :  { %s973_s19 = scalar_lea.vmem %s1169_s8, 2048  ;;  %p978_p13 = scmp.lt.s32.totalorder %s1169_s8, %s1169_s8 }
 0x177   :  { %p974_p12 = scmp.ne.s32.totalorder %s1169_s8, %s973_s19  ;;  %p979_p0 = scmp.lt.s32.totalorder %s973_s19, %s973_s19 }
 0x179   :  { %p980_p1 = por %p979_p0, %p978_p13 }
 0x17b   :  { %p981_p2 = pnand %p980_p1, %p974_p12 }
 0x17d   :  { %984 = shalt.err (!%p981_p2)
}
 0x17e   :  { %s985_s22 = scalar_lea.hbm %s1213_s7, 2048 }
 0x17f   :  { %p986_p3 = scmp.ne.s32.totalorder %s1213_s7, %s985_s22  ;;  %p989_p4 = scmp.lt.u32.totalorder %s985_s22, %s1213_s7 }
 0x181   :  { %p991_p5 = pnand %p989_p4, %p986_p3 }
 0x183   :  { %994 = shalt.err (!%p991_p5)
}
 0x184   :  { %537 = dma.vmem_to_hbm [thread:$0]  %s1169_s8, 2048, %s1213_s7, [#allocation12], %s1007_s13, %s1007_s13, %s1008_s14  }
 0x185   :  { %1001 = dma.done.wait [#allocation4], 2048  }
 0x186   :  { %1002 = vsyncadd [#allocation4], 4294965248 }
 0x187   :  { %1003 = dma.done.wait [#allocation12], 2048  }
 0x188   :  { %1004 = vsyncadd [#allocation12], 4294965248 }
 0x189   :  { %544 = vsyncpa [#allocation3], 1 }
 0x18a   :  { %545 = vsyncpa [#allocation6], 1 }
 0x18b   :  { %546 = vsyncpa [#allocation9], 1 }
 0x18c   :  { %547 = vsyncpa [#allocation4], 1 }
 0x18d   :  { %548 = vsyncpa [#allocation12], 1 }

</bundles_post_ra>
